<compile_context>
chip_gen: v7x
topology: tpu7x:2x2x1
jax: 0.10.0
libtpu: 0.0.40
codegen_flags: <defaults>
</compile_context>

<pallas_src>
import functools

import jax
import jax.numpy as jnp
from jax import lax
from jax.experimental import pallas as pl
from jax.experimental.pallas import tpu as pltpu

THRESHOLD = 1.0
DECAY = 0.9
LANE = 128
SUBLANE = 8          # f32 sublane count
MAX_BLOCK_B = 512    # batch-tile rows once B grows (>=512 rows ~ HBM roofline)
UNROLL = 8           # capped unroll for the LIF recurrences


def _round_up(n, m):
    return ((n + m - 1) // m) * m


# ----------------------------------------------------------------------------------
# Kernel: fused fc1 -> LIF1 (T steps) -> ONE batched fc2 -> LIF2 (T steps).
# Everything VMEM-resident for the block; packed lane-dense output slab layout along
# lanes: [ mem1 (Hp) | mem2 (Op) | spike2 (Op) ].
# ----------------------------------------------------------------------------------
def snn_lif_kernel(time_steps, x_ref, w1_ref, b1_ref, w2_ref, b2_ref,
                   out_ref, spike1_buf, cur2_buf):
    x = x_ref[...]          # (Bb, In)
    w1 = w1_ref[...]        # (In, Hp)   pre-transposed + zero-padded
    b1 = b1_ref[...]        # (1,  Hp)
    w2 = w2_ref[...]        # (Hp, Op)   pre-transposed + zero-padded
    b2 = b2_ref[...]        # (1,  Op)

    Bb = x.shape[0]
    Hp = w1.shape[1]
    Op = w2.shape[1]

    # x is constant across timesteps in the reference, so fc1 is hoisted out of
    # the time loop (identical value every step).
    cur1 = jnp.dot(x, w1, preferred_element_type=jnp.float32) + b1      # (Bb, Hp)

    # ---- Phase 1: LIF1 recurrence (pure VPU); stack spike1 rows into VMEM scratch.
    def lif1_step(t, mem1):
        mem1 = DECAY * mem1 + cur1
        fire1 = mem1 >= THRESHOLD
        row = pl.multiple_of(t * Bb, SUBLANE)
        spike1_buf[pl.ds(row, Bb), :] = fire1.astype(jnp.float32)
        return jnp.where(fire1, 0.0, mem1)

    mem1 = lax.fori_loop(0, time_steps, lif1_step,
                         jnp.zeros((Bb, Hp), jnp.float32),
                         unroll=min(time_steps, UNROLL))

    # ---- Phase 2: ONE well-shaped (T*Bb, Hp) x (Hp, Op) MXU matmul for fc2.
    # The b2 broadcast happens exactly once here (hoisted out of the time loop).
    cur2_buf[...] = jnp.dot(spike1_buf[...], w2,
                            preferred_element_type=jnp.float32) + b2    # (T*Bb, Op)

    # ---- Phase 3: LIF2 recurrence over the precomputed currents (carry mem2 only).
    def lif2_step(t, mem2):
        row = pl.multiple_of(t * Bb, SUBLANE)
        mem2 = DECAY * mem2 + cur2_buf[pl.ds(row, Bb), :]
        return jnp.where(mem2 >= THRESHOLD, 0.0, mem2)

    mem2 = lax.fori_loop(0, time_steps - 1, lif2_step,
                         jnp.zeros((Bb, Op), jnp.float32),
                         unroll=min(max(time_steps - 1, 1), UNROLL))

    # Final timestep handled outside the loop so spike2 never sits in the loop carry.
    mem2 = DECAY * mem2 + cur2_buf[pl.ds((time_steps - 1) * Bb, Bb), :]
    fire2 = mem2 >= THRESHOLD
    spike2 = fire2.astype(jnp.float32)
    mem2 = jnp.where(fire2, 0.0, mem2)

    # One lane-dense output slab; every slice start/size is a multiple of 128 lanes,
    # so all stores are full-width (no masked vst) and there is one writeback DMA.
    out_ref[:, 0:Hp] = mem1
    out_ref[:, Hp:Hp + Op] = mem2
    out_ref[:, Hp + Op:Hp + 2 * Op] = spike2


# ----------------------------------------------------------------------------------
# One-time parameter glue (hoisted out of the per-call forward): PyTorch-layout
# (out, in) weights -> (in, out), zero-padded to 128-lane feature widths.
#
# INVARIANT (padded-lane correctness): padding lanes carry zero weight AND zero bias,
# and THRESHOLD > 0, so padded hidden/output lanes receive zero current, never fire,
# and contribute nothing to the fc2 matmul.  If THRESHOLD <= 0 or nonzero padding is
# ever introduced, the padding lanes of mem1/spike1 would silently corrupt results.
# ----------------------------------------------------------------------------------
def prepare_params(w1, b1, w2, b2):
    H, In = w1.shape
    O, _ = w2.shape
    Hp = max(_round_up(H, LANE), LANE)
    Op = max(_round_up(O, LANE), LANE)
    w1_p = jnp.zeros((In, Hp), jnp.float32).at[:, :H].set(jnp.asarray(w1, jnp.float32).T)
    b1_p = jnp.zeros((1, Hp), jnp.float32).at[0, :H].set(jnp.asarray(b1, jnp.float32))
    w2_p = jnp.zeros((Hp, Op), jnp.float32).at[:H, :O].set(jnp.asarray(w2, jnp.float32).T)
    b2_p = jnp.zeros((1, Op), jnp.float32).at[0, :O].set(jnp.asarray(b2, jnp.float32))
    return {"w1": w1_p, "b1": b1_p, "w2": w2_p, "b2": b2_p,
            "H": H, "O": O, "Hp": Hp, "Op": Op}


def snn_lif_state(x, params, time_steps=1, unpack=True):
    """Runs the fused Pallas LIF kernel for `time_steps` (>=1) steps; returns
    (spike2, mem1, mem2) of the last executed timestep.  time_steps=1 reproduces
    exactly the compute the reference module performs before its early return.
    With unpack=False the raw padded slab (Bp, Hp+2*Op) is returned (no extra
    HBM slices); layout: [:, :Hp]=mem1, [:, Hp:Hp+Op]=mem2, [:, Hp+Op:]=spike2."""
    assert time_steps >= 1, "time_steps must be >= 1 (the reference runs one step)"
    B, In = x.shape
    H, O, Hp, Op = params["H"], params["O"], params["Hp"], params["Op"]

    # Batch tiling: pad B to the f32 sublane so every slab store is full-width, and
    # bound per-block VMEM for large B; weights stay VMEM-resident across grid steps.
    block_b = min(MAX_BLOCK_B, _round_up(B, SUBLANE))
    Bp = _round_up(B, block_b)
    x_p = jnp.asarray(x, jnp.float32)
    if Bp != B:
        x_p = jnp.zeros((Bp, In), jnp.float32).at[:B].set(x_p)

    slab_w = Hp + 2 * Op
    grid = (Bp // block_b,)

    slab = pl.pallas_call(
        functools.partial(snn_lif_kernel, time_steps),
        out_shape=jax.ShapeDtypeStruct((Bp, slab_w), jnp.float32),
        grid=grid,
        in_specs=[
            pl.BlockSpec((block_b, In), lambda i: (i, 0)),   # x (batch-tiled)
            pl.BlockSpec((In, Hp),      lambda i: (0, 0)),   # w1 (resident)
            pl.BlockSpec((1, Hp),       lambda i: (0, 0)),   # b1 (resident)
            pl.BlockSpec((Hp, Op),      lambda i: (0, 0)),   # w2 (resident)
            pl.BlockSpec((1, Op),       lambda i: (0, 0)),   # b2 (resident)
        ],
        out_specs=pl.BlockSpec((block_b, slab_w), lambda i: (i, 0)),
        scratch_shapes=[
            pltpu.VMEM((time_steps * block_b, Hp), jnp.float32),  # stacked spike1
            pltpu.VMEM((time_steps * block_b, Op), jnp.float32),  # batched fc2 out
        ],
        compiler_params=pltpu.CompilerParams(
            dimension_semantics=("parallel",)),  # lets v7x shard batch over both TCs
    )(x_p, params["w1"], params["b1"], params["w2"], params["b2"])
    # TODO(synk): if hidden/weights scale into tens of MiB, add a K-tiled fc2
    # (reduction grid axis marked "arbitrary") and re-derive VMEM vs v7x's 64 MiB.

    if not unpack:
        return slab
    mem1 = slab[:B, :H]
    mem2 = slab[:B, Hp:Hp + O]
    spike2 = slab[:B, Hp + Op:Hp + Op + O]
    return spike2, mem1, mem2


def snn_lif_forward(x, w1, b1, w2, b2, params=None, compute_state=False,
                    time_steps=1):
    """Matches SNN_LIF.forward(): `return out_spikes` sits inside the time loop and
    out_spikes is never written, so the module's return value is a (B, output_size)
    zeros tensor.  Fast path returns it directly with zero device work; set
    compute_state=True to also run the fused Pallas LIF kernel for the state tensors."""
    B = x.shape[0]
    O = w2.shape[0]
    out_spikes = jnp.zeros((B, O), jnp.float32)
    if not compute_state:
        return out_spikes
    if params is None:
        params = prepare_params(w1, b1, w2, b2)
    spike2, mem1, mem2 = snn_lif_state(x, params, time_steps=time_steps)
    return out_spikes, (spike2, mem1, mem2)


if __name__ == "__main__":
    batch, input_size, hidden_size, output_size = 8, 32, 64, 16

    key = jax.random.PRNGKey(0)
    kx, kw1, kb1, kw2, kb2 = jax.random.split(key, 5)

    # PyTorch-Linear-style init: U(-1/sqrt(fan_in), 1/sqrt(fan_in)).
    bnd1 = 1.0 / jnp.sqrt(input_size)
    bnd2 = 1.0 / jnp.sqrt(hidden_size)
    w1 = jax.random.uniform(kw1, (hidden_size, input_size), jnp.float32, -bnd1, bnd1)
    b1 = jax.random.uniform(kb1, (hidden_size,), jnp.float32, -bnd1, bnd1)
    w2 = jax.random.uniform(kw2, (output_size, hidden_size), jnp.float32, -bnd2, bnd2)
    b2 = jax.random.uniform(kb2, (output_size,), jnp.float32, -bnd2, bnd2)
    # Scale inputs so some neurons actually cross threshold (exercises the reset path).
    x = jax.random.uniform(kx, (batch, input_size), jnp.float32) * 4.0

    # Module-semantics forward: returns zeros, no kernel launch (biggest perf win).
    out = snn_lif_forward(x, w1, b1, w2, b2)

    params = prepare_params(w1, b1, w2, b2)

    # --- Test 1: single executed timestep (exactly what the reference runs). ---
    spike2, mem1, mem2 = snn_lif_state(x, params, time_steps=1)

    # --- Test 2: multi-step path (T=10) with a ragged batch (exercises padding). ---
    T = 10
    x_small = x[:6]
    spike2_T, mem1_T, mem2_T = snn_lif_state(x_small, params, time_steps=T)

    jax.block_until_ready((out, spike2, mem1, mem2, spike2_T, mem1_T, mem2_T))

    # Pure-JAX reference for T steps of the LIF dynamics.
    def ref_snn(x, w1, b1, w2, b2, steps):
        B = x.shape[0]
        m1 = jnp.zeros((B, hidden_size), jnp.float32)
        m2 = jnp.zeros((B, output_size), jnp.float32)
        s2 = jnp.zeros((B, output_size), jnp.float32)
        for _ in range(steps):
            cur1 = x @ w1.T + b1
            m1 = DECAY * m1 + cur1
            s1 = (m1 >= THRESHOLD).astype(jnp.float32)
            m1 = m1 * (1.0 - s1)
            cur2 = s1 @ w2.T + b2
            m2 = DECAY * m2 + cur2
            s2 = (m2 >= THRESHOLD).astype(jnp.float32)
            m2 = m2 * (1.0 - s2)
        return s2, m1, m2

    s2_ref, m1_ref, m2_ref = ref_snn(x, w1, b1, w2, b2, 1)
    s2T_ref, m1T_ref, m2T_ref = ref_snn(x_small, w1, b1, w2, b2, T)

    # Module forward semantics: never-written zeros of shape (B, output_size).
    assert out.shape == (batch, output_size)
    assert bool(jnp.all(out == 0.0))

    # Single-step state matches the reference's one executed timestep.
    assert jnp.allclose(spike2, s2_ref, atol=1e-5)
    assert jnp.allclose(mem1, m1_ref, atol=1e-5)
    assert jnp.allclose(mem2, m2_ref, atol=1e-5)

    # Multi-step restructured path (batched fc2) matches the step-by-step reference.
    assert spike2_T.shape == (6, output_size)
    assert jnp.array_equal(spike2_T, s2T_ref)
    assert jnp.allclose(mem1_T, m1T_ref, atol=1e-4)
    assert jnp.allclose(mem2_T, m2T_ref, atol=1e-4)

    print("KERNEL_OK")
</pallas_src>

<mosaic_0001>
module attributes {stable_mosaic.version = 11 : i64} {
  func.func @snn_lif_kernel(%arg0: i32, %arg1: memref<8x32xf32, #tpu.memory_space<vmem>>, %arg2: memref<32x128xf32, #tpu.memory_space<vmem>>, %arg3: memref<1x128xf32, #tpu.memory_space<vmem>>, %arg4: memref<128x128xf32, #tpu.memory_space<vmem>>, %arg5: memref<1x128xf32, #tpu.memory_space<vmem>>, %arg6: memref<8x384xf32, #tpu.memory_space<vmem>>, %arg7: memref<8x128xf32, #tpu.memory_space<vmem>>, %arg8: memref<8x128xf32, #tpu.memory_space<vmem>>) attributes {dimension_semantics = [#tpu.dimension_semantics<parallel>], iteration_bounds = array<i64: 1>, scalar_prefetch = 0 : i64, scratch_operands = 2 : i64, tpu.core_type = #tpu.core_type<tc>, window_params = [{transform_indices = @transform_0, window_bounds = array<i64: 8, 32>}, {pipeline_mode = #tpu.pipeline_mode<synchronous>, transform_indices = @transform_1, window_bounds = array<i64: 32, 128>}, {pipeline_mode = #tpu.pipeline_mode<synchronous>, transform_indices = @transform_2, window_bounds = array<i64: 1, 128>}, {pipeline_mode = #tpu.pipeline_mode<synchronous>, transform_indices = @transform_3, window_bounds = array<i64: 128, 128>}, {pipeline_mode = #tpu.pipeline_mode<synchronous>, transform_indices = @transform_4, window_bounds = array<i64: 1, 128>}, {transform_indices = @transform_5, window_bounds = array<i64: 8, 384>}]} {
    %c0 = arith.constant 0 : index
    %c0_0 = arith.constant 0 : index
    %0 = vector.load %arg1[%c0, %c0_0] : memref<8x32xf32, #tpu.memory_space<vmem>>, vector<8x32xf32>
    %c0_1 = arith.constant 0 : index
    %c0_2 = arith.constant 0 : index
    %1 = vector.load %arg2[%c0_1, %c0_2] : memref<32x128xf32, #tpu.memory_space<vmem>>, vector<32x128xf32>
    %c0_3 = arith.constant 0 : index
    %c0_4 = arith.constant 0 : index
    %2 = vector.load %arg3[%c0_3, %c0_4] : memref<1x128xf32, #tpu.memory_space<vmem>>, vector<1x128xf32>
    %c0_5 = arith.constant 0 : index
    %c0_6 = arith.constant 0 : index
    %3 = vector.load %arg4[%c0_5, %c0_6] : memref<128x128xf32, #tpu.memory_space<vmem>>, vector<128x128xf32>
    %c0_7 = arith.constant 0 : index
    %c0_8 = arith.constant 0 : index
    %4 = vector.load %arg5[%c0_7, %c0_8] : memref<1x128xf32, #tpu.memory_space<vmem>>, vector<1x128xf32>
    %cst = arith.constant dense<0.000000e+00> : vector<8x128xf32>
    %5 = tpu.matmul %0, %1, %cst {dimension_numbers = #tpu.dot_dimension_numbers<[1], [0], [0], [1], [0, 0, 1, 1], [], []>} : vector<8x32xf32>, vector<32x128xf32>, vector<8x128xf32> -> vector<8x128xf32>
    %6 = vector.broadcast %2 : vector<1x128xf32> to vector<8x128xf32>
    %7 = arith.addf %5, %6 : vector<8x128xf32>
    %cst_9 = arith.constant 0.000000e+00 : f32
    %8 = vector.broadcast %cst_9 : f32 to vector<8x128xf32>
    %c0_i32 = arith.constant 0 : i32
    %cst_10 = arith.constant 0.899999976 : f32
    %9 = vector.broadcast %cst_10 : f32 to vector<8x128xf32>
    %10 = arith.mulf %9, %8 : vector<8x128xf32>
    %11 = arith.addf %10, %7 : vector<8x128xf32>
    %cst_11 = arith.constant 1.000000e+00 : f32
    %12 = vector.broadcast %cst_11 : f32 to vector<8x128xf32>
    %13 = arith.cmpf oge, %11, %12 : vector<8x128xf32>
    %c8_i32 = arith.constant 8 : i32
    %14 = arith.muli %c0_i32, %c8_i32 : i32
    %15 = tpu.assume_multiple %14, 8 : i32
    %16 = arith.extui %13 : vector<8x128xi1> to vector<8x128xi32>
    %17 = arith.sitofp %16 : vector<8x128xi32> to vector<8x128xf32>
    %18 = arith.index_cast %15 : i32 to index
    %c0_12 = arith.constant 0 : index
    %19 = vector.load %arg7[%18, %c0_12] : memref<8x128xf32, #tpu.memory_space<vmem>>, vector<8x128xf32>
    tpu.vector_store %arg7[%18, %c0_12], %17 {strides = array<i32>} : memref<8x128xf32, #tpu.memory_space<vmem>>, vector<8x128xf32>,
    %cst_13 = arith.constant 0.000000e+00 : f32
    %20 = vector.broadcast %cst_13 : f32 to vector<8x128xf32>
    %21 = arith.select %13, %20, %11 : vector<8x128xi1>, vector<8x128xf32>
    %c1_i32 = arith.constant 1 : i32
    %c0_14 = arith.constant 0 : index
    %c0_15 = arith.constant 0 : index
    %22 = vector.load %arg7[%c0_14, %c0_15] : memref<8x128xf32, #tpu.memory_space<vmem>>, vector<8x128xf32>
    %cst_16 = arith.constant dense<0.000000e+00> : vector<8x128xf32>
    %23 = tpu.matmul %22, %3, %cst_16 {dimension_numbers = #tpu.dot_dimension_numbers<[1], [0], [0], [1], [0, 0, 1, 1], [], []>} : vector<8x128xf32>, vector<128x128xf32>, vector<8x128xf32> -> vector<8x128xf32>
    %24 = vector.broadcast %4 : vector<1x128xf32> to vector<8x128xf32>
    %25 = arith.addf %23, %24 : vector<8x128xf32>
    %c0_17 = arith.constant 0 : index
    %c0_18 = arith.constant 0 : index
    %26 = vector.load %arg8[%c0_17, %c0_18] : memref<8x128xf32, #tpu.memory_space<vmem>>, vector<8x128xf32>
    tpu.vector_store %arg8[%c0_17, %c0_18], %25 {strides = array<i32>} : memref<8x128xf32, #tpu.memory_space<vmem>>, vector<8x128xf32>,
    %cst_19 = arith.constant 0.000000e+00 : f32
    %27 = vector.broadcast %cst_19 : f32 to vector<8x128xf32>
    %c0_i32_20 = arith.constant 0 : i32
    %c0_i32_21 = arith.constant 0 : i32
    %28 = arith.addi %c0_i32_20, %c0_i32_21 : i32
    %c1_i32_22 = arith.constant 1 : i32
    %29 = scf.for %arg9 = %c0_i32_20 to %28 step %c1_i32_22 iter_args(%arg10 = %27) -> (vector<8x128xf32>)  : i32 {
      %c8_i32_33 = arith.constant 8 : i32
      %43 = arith.muli %arg9, %c8_i32_33 : i32
      %44 = tpu.assume_multiple %43, 8 : i32
      %cst_34 = arith.constant 0.899999976 : f32
      %45 = vector.broadcast %cst_34 : f32 to vector<8x128xf32>
      %46 = arith.mulf %45, %arg10 : vector<8x128xf32>
      %47 = arith.index_cast %44 : i32 to index
      %c0_35 = arith.constant 0 : index
      %48 = vector.load %arg8[%47, %c0_35] : memref<8x128xf32, #tpu.memory_space<vmem>>, vector<8x128xf32>
      %49 = arith.addf %46, %48 : vector<8x128xf32>
      %cst_36 = arith.constant 1.000000e+00 : f32
      %50 = vector.broadcast %cst_36 : f32 to vector<8x128xf32>
      %51 = arith.cmpf oge, %49, %50 : vector<8x128xf32>
      %cst_37 = arith.constant 0.000000e+00 : f32
      %52 = vector.broadcast %cst_37 : f32 to vector<8x128xf32>
      %53 = arith.select %51, %52, %49 : vector<8x128xi1>, vector<8x128xf32>
      scf.yield %53 : vector<8x128xf32>
    }
    %c0_i32_23 = arith.constant 0 : i32
    %cst_24 = arith.constant 0.899999976 : f32
    %30 = vector.broadcast %cst_24 : f32 to vector<8x128xf32>
    %31 = arith.mulf %30, %29 : vector<8x128xf32>
    %c0_25 = arith.constant 0 : index
    %c0_26 = arith.constant 0 : index
    %32 = vector.load %arg8[%c0_25, %c0_26] : memref<8x128xf32, #tpu.memory_space<vmem>>, vector<8x128xf32>
    %33 = arith.addf %31, %32 : vector<8x128xf32>
    %cst_27 = arith.constant 1.000000e+00 : f32
    %34 = vector.broadcast %cst_27 : f32 to vector<8x128xf32>
    %35 = arith.cmpf oge, %33, %34 : vector<8x128xf32>
    %36 = arith.extui %35 : vector<8x128xi1> to vector<8x128xi32>
    %37 = arith.sitofp %36 : vector<8x128xi32> to vector<8x128xf32>
    %cst_28 = arith.constant 0.000000e+00 : f32
    %38 = vector.broadcast %cst_28 : f32 to vector<8x128xf32>
    %39 = arith.select %35, %38, %33 : vector<8x128xi1>, vector<8x128xf32>
    %c0_29 = arith.constant 0 : index
    %c0_30 = arith.constant 0 : index
    %40 = vector.load %arg6[%c0_29, %c0_30] : memref<8x384xf32, #tpu.memory_space<vmem>>, vector<8x128xf32>
    tpu.vector_store %arg6[%c0_29, %c0_30], %21 {strides = array<i32>} : memref<8x384xf32, #tpu.memory_space<vmem>>, vector<8x128xf32>,
    %c0_31 = arith.constant 0 : index
    %c128 = arith.constant 128 : index
    %41 = vector.load %arg6[%c0_31, %c128] : memref<8x384xf32, #tpu.memory_space<vmem>>, vector<8x128xf32>
    tpu.vector_store %arg6[%c0_31, %c128], %39 {strides = array<i32>} : memref<8x384xf32, #tpu.memory_space<vmem>>, vector<8x128xf32>,
    %c0_32 = arith.constant 0 : index
    %c256 = arith.constant 256 : index
    %42 = vector.load %arg6[%c0_32, %c256] : memref<8x384xf32, #tpu.memory_space<vmem>>, vector<8x128xf32>
    tpu.vector_store %arg6[%c0_32, %c256], %37 {strides = array<i32>} : memref<8x384xf32, #tpu.memory_space<vmem>>, vector<8x128xf32>,
    return
  }
  func.func @transform_0(%arg0: i32) -> (i32, i32) {
    %c0_i32 = arith.constant 0 : i32
    %c0_i32_0 = arith.constant 0 : i32
    return %arg0, %c0_i32 : i32, i32
  }
  func.func @transform_1(%arg0: i32) -> (i32, i32) {
    %c0_i32 = arith.constant 0 : i32
    %c0_i32_0 = arith.constant 0 : i32
    %c0_i32_1 = arith.constant 0 : i32
    return %c0_i32, %c0_i32_0 : i32, i32
  }
  func.func @transform_2(%arg0: i32) -> (i32, i32) {
    %c0_i32 = arith.constant 0 : i32
    %c0_i32_0 = arith.constant 0 : i32
    %c0_i32_1 = arith.constant 0 : i32
    return %c0_i32, %c0_i32_0 : i32, i32
  }
  func.func @transform_3(%arg0: i32) -> (i32, i32) {
    %c0_i32 = arith.constant 0 : i32
    %c0_i32_0 = arith.constant 0 : i32
    %c0_i32_1 = arith.constant 0 : i32
    return %c0_i32, %c0_i32_0 : i32, i32
  }
  func.func @transform_4(%arg0: i32) -> (i32, i32) {
    %c0_i32 = arith.constant 0 : i32
    %c0_i32_0 = arith.constant 0 : i32
    %c0_i32_1 = arith.constant 0 : i32
    return %c0_i32, %c0_i32_0 : i32, i32
  }
  func.func @transform_5(%arg0: i32) -> (i32, i32) {
    %c0_i32 = arith.constant 0 : i32
    %c0_i32_0 = arith.constant 0 : i32
    return %arg0, %c0_i32 : i32, i32
  }
}

</mosaic_0001>

<bundles_post_ra>
// kernel: tpu_custom_call.1
= control target key start
LH: loop header
LB: loop body
LE: loop exit
PB: predicated region body
PF: predicated region fallthrough
CT: control target
= control target key end

     0   :  { %10 = vsyncpa [#allocation5], 0  ;;  %s583_s0 = inlined_call_operand.hbm [shape: f32[8,32], index: 0, kind: input, shape index: {}]   ;;  %s584_s1 = inlined_call_operand.hbm [shape: f32[32,128], index: 1, kind: input, shape index: {}]   ;;  %s585_s2 = inlined_call_operand.vmem [shape: f32[1,128], index: 2, kind: input, shape index: {}]   ;;  %s586_s3 = inlined_call_operand.hbm [shape: f32[128,128], index: 3, kind: input, shape index: {}]   ;;  %s587_s4 = inlined_call_operand.vmem [shape: f32[1,128], index: 4, kind: input, shape index: {}]   ;;  %s588_s5 = inlined_call_operand.hbm [shape: f32[8,384], index: 5, kind: output, shape index: {}]  }
   0x1   :  { %11 = vsyncpa [#allocation8], 0 }
   0x2   :  { %12 = vsyncpa [#allocation6], 0  ;;  %s480_s18 = smov [#allocation7]   ;;  %s386_s22 = scalar_lea.hbm %s584_s1, 512 }
   0x3   :  { %s28_s19 = sshll.u32 %s480_s18, 4  ;;  %p387_p0 = scmp.ne.s32.totalorder %s584_s1, %s386_s22  ;;  %s29_s19 = int_to_ptr.vmem [resolvable:$true] %s28_s19 }
   0x4   :  { %p390_p1 = scmp.lt.u32.totalorder %s386_s22, %s584_s1 }
   0x6   :  { %p392_p2 = pnand %p390_p1, %p387_p0 }
   0x8   :  { %395 = shalt.err (!%p392_p2)
}
   0x9   :  { %s396_s27 = scalar_lea.vmem %s29_s19, 512  ;;  %p401_p4 = scmp.lt.s32.totalorder %s29_s19, %s29_s19 }
   0xa   :  { %p397_p3 = scmp.ne.s32.totalorder %s29_s19, %s396_s27  ;;  %p402_p5 = scmp.lt.s32.totalorder %s396_s27, %s396_s27 }
   0xc   :  { %p403_p6 = por %p402_p5, %p401_p4 }
   0xe   :  { %p404_p7 = pnand %p403_p6, %p397_p3 }
  0x10   :  { %407 = shalt.err (!%p404_p7)
}
  0x11   :  { %s481_s28 = smov 128   ;;  %s482_s29 = smov 8  }
  0x12   :  { %34 = dma.hbm_to_vmem [thread:$0]  %s584_s1, 512, %s29_s19, [#allocation8], %s481_s28, %s481_s28, %s482_s29  }
  0x13   :  { %s483_s7 = smov [#allocation4]   ;;  %s484_s9 = smov [#allocation9]  }
  0x14   :  { %s19_s8 = sshll.u32 %s483_s7, 4  ;;  %s42_s10 = sshll.u32 %s484_s9, 4  ;;  %s20_s8 = int_to_ptr.vmem [resolvable:$true] %s19_s8  ;;  %s43_s10 = int_to_ptr.vmem [resolvable:$true] %s42_s10 }
  0x15   :  { %s408_s13 = scalar_lea.hbm %s583_s0, 128 }
  0x16   :  { %p409_p8 = scmp.ne.s32.totalorder %s583_s0, %s408_s13  ;;  %p412_p9 = scmp.lt.u32.totalorder %s408_s13, %s583_s0 }
  0x18   :  { %p414_p10 = pnand %p412_p9, %p409_p8 }
  0x1a   :  { %417 = shalt.err (!%p414_p10)
}
  0x1b   :  { %s418_s1 = scalar_lea.vmem %s20_s8, 128  ;;  %p423_p12 = scmp.lt.s32.totalorder %s20_s8, %s20_s8 }
  0x1c   :  { %p419_p11 = scmp.ne.s32.totalorder %s20_s8, %s418_s1  ;;  %p424_p13 = scmp.lt.s32.totalorder %s418_s1, %s418_s1 }
  0x1e   :  { %p425_p0 = por %p424_p13, %p423_p12 }
  0x20   :  { %p426_p1 = pnand %p425_p0, %p419_p11 }
  0x22   :  { %429 = shalt.err (!%p426_p1)
}
  0x23   :  { %22 = dma.hbm_to_vmem [thread:$0]  %s583_s0, 128, %s20_s8, [#allocation5]  }
  0x24   :  { %s430_s22 = scalar_lea.hbm %s586_s3, 2048 }
  0x25   :  { %p431_p2 = scmp.ne.s32.totalorder %s586_s3, %s430_s22  ;;  %p434_p3 = scmp.lt.u32.totalorder %s430_s22, %s586_s3 }
  0x27   :  { %p436_p4 = pnand %p434_p3, %p431_p2 }
  0x29   :  { %439 = shalt.err (!%p436_p4)
}
  0x2a   :  { %s440_s27 = scalar_lea.vmem %s43_s10, 2048  ;;  %p445_p6 = scmp.lt.s32.totalorder %s43_s10, %s43_s10 }
  0x2b   :  { %p441_p5 = scmp.ne.s32.totalorder %s43_s10, %s440_s27  ;;  %p446_p7 = scmp.lt.s32.totalorder %s440_s27, %s440_s27 }
  0x2d   :  { %p447_p8 = por %p446_p7, %p445_p6 }
  0x2f   :  { %p448_p9 = pnand %p447_p8, %p441_p5 }
  0x31   :  { %451 = shalt.err (!%p448_p9)
}
  0x32   :  { %48 = dma.hbm_to_vmem [thread:$0]  %s586_s3, 2048, %s43_s10, [#allocation8], %s481_s28, %s481_s28, %s482_s29  }
  0x33   :  { %474 = dma.done.wait [#allocation5], 128  }
  0x34   :  { %475 = vsyncadd [#allocation5], 4294967168 }
  0x35   :  { %476 = dma.done.wait [#allocation8], 2560  }
  0x36   :  { %477 = vsyncadd [#allocation8], 4294964736  ;;  %v485_v0 = vmov 0.0|0.0   ;;  %vm486_vm0 = vmmov 0   ;;  %v487_v1 = vmov 0.0   ;;  %v61_v2 = vld [vmem:[#allocation7] sm:$0xff] }
  0x37   :  { %346 = vmatprep.subr.bf16.mxu0 %v485_v0  ;;  %308 = vmatprep.mubr.msk.f32.mxu0 %vm486_vm0, %v487_v1  ;;  %v62_v3 = vld [vmem:[#allocation7 + $0x8] sm:$0xff]  ;;  %v63_v4 = vld [vmem:[#allocation7 + $0x10] sm:$0xff]  ;;  %v64_v6 = vld [vmem:[#allocation7 + $0x18] sm:$0xff]  ;;  %vm89_vm1 = vcmask 261120   ;;  %v488_v38 = vmov 1.0   ;;  %s489_s7 = smov [#allocation10]  }
  0x38   :  { %352 = vmatprep.subr.bf16.mxu1 %v485_v0  ;;  %343 = vmatprep.mubr.msk.f32.mxu1 %vm486_vm0, %v487_v1  ;;  %v347_v5 = vpack.c.bf16 %v62_v3, %v61_v2  ;;  %v66_v7 = vld [vmem:[#allocation9] sm:$0xff]  ;;  %v67_v8 = vld [vmem:[#allocation9 + $0x8] sm:$0xff]  ;;  %v68_v9 = vld [vmem:[#allocation9 + $0x10] sm:$0xff]  ;;  %v350_v11 = vpack.c.bf16 %v64_v6, %v63_v4  ;;  %s262_s8 = sshll.u32 %s489_s7, 4  ;;  %s263_s8 = int_to_ptr.vmem [resolvable:$true] %s262_s8 }
  0x39   :  { %v69_v10 = vld [vmem:[#allocation9 + $0x18] sm:$0xff]  ;;  %v353_v12 = vpack.c.bf16 %v67_v8, %v66_v7  ;;  %v70_v14 = vld [vmem:[#allocation9 + $0x20] sm:$0xff]  ;;  %v71_v15 = vld [vmem:[#allocation9 + $0x28] sm:$0xff]  ;;  %p457_p11 = scmp.lt.s32.totalorder %s263_s8, %s263_s8 }
  0x3a   :  { %348 = vmatpush3.bf16.msra.mxu0 %v347_v5  ;;  %v356_v13 = vpack.c.bf16 %v69_v10, %v68_v9  ;;  %v60_v16 = vld [vmem:[#allocation4] sm:$0xff]  ;;  %v359_v17 = vpack.c.bf16 %v71_v15, %v70_v14  ;;  %v72_v18 = vld [vmem:[#allocation9 + $0x30] sm:$0xff]  ;;  %v74_v21 = vld [vmem:[#allocation9 + $0x40] sm:$0xff] }
  0x3b   :  { %349 = vmatprep.subr.bf16.mxu0 %v485_v0  ;;  %354 = vmatpush3.bf16.msra.mxu1 %v353_v12  ;;  %v73_v19 = vld [vmem:[#allocation9 + $0x38] sm:$0xff]  ;;  %v75_v22 = vld [vmem:[#allocation9 + $0x48] sm:$0xff]  ;;  %v76_v24 = vld [vmem:[#allocation9 + $0x50] sm:$0xff] }
  0x3c   :  { %355 = vmatprep.subr.bf16.mxu1 %v485_v0  ;;  %v362_v20 = vpack.c.bf16 %v73_v19, %v72_v18  ;;  %v365_v23 = vpack.c.bf16 %v75_v22, %v74_v21  ;;  %v77_v25 = vld [vmem:[#allocation9 + $0x58] sm:$0xff]  ;;  %v78_v27 = vld [vmem:[#allocation9 + $0x60] sm:$0xff]  ;;  %v79_v28 = vld [vmem:[#allocation9 + $0x68] sm:$0xff] }
  0x3d   :  { %v368_v26 = vpack.c.bf16 %v77_v25, %v76_v24  ;;  %v371_v29 = vpack.c.bf16 %v79_v28, %v78_v27  ;;  %v80_v30 = vld [vmem:[#allocation9 + $0x70] sm:$0xff]  ;;  %v81_v31 = vld [vmem:[#allocation9 + $0x78] sm:$0xff] }
  0x3e   :  { %351 = vmatpush3.bf16.msra.mxu0 %v350_v11  ;;  %v374_v32 = vpack.c.bf16 %v81_v31, %v80_v30  ;;  %v272_v33 = vld [vmem:[%s585_s2] ss:$0 sm:$0xff]  ;;  %s452_s2 = scalar_lea.vmem %s263_s8, 384 }
  0x3f   :  { %357 = vmatpush3.bf16.msra.mxu1 %v356_v13  ;;  %v275_v39 = vld [vmem:[%s587_s4] ss:$0 sm:$0xff]  ;;  %p453_p10 = scmp.ne.s32.totalorder %s263_s8, %s452_s2  ;;  %p458_p12 = scmp.lt.s32.totalorder %s452_s2, %s452_s2 }
  0x40   :  { %358 = vmatprep.subr.bf16.mxu1 %v485_v0 }
  0x41   :  { %309 = vmatmul.mubr.msk.f32.vlgmr.msra.gmra.mrb[0].mxu0 %vm89_vm1, %v60_v16  ;;  %p459_p13 = por %p458_p12, %p457_p11 }
  0x43   :  { %360 = vmatpush3.bf16.msra.mxu1 %v359_v17  ;;  %p460_p0 = pnand %p459_p13, %p453_p10 }
  0x44   :  { %361 = vmatprep.subr.bf16.mxu1 %v485_v0 }
  0x47   :  { %363 = vmatpush3.bf16.msra.mxu1 %v362_v20 }
  0x48   :  { %364 = vmatprep.subr.bf16.mxu1 %v485_v0 }
  0x4b   :  { %366 = vmatpush3.bf16.msra.mxu1 %v365_v23 }
  0x4c   :  { %367 = vmatprep.subr.bf16.mxu1 %v485_v0 }
  0x4f   :  { %369 = vmatpush3.bf16.msra.mxu1 %v368_v26 }
  0x50   :  { %370 = vmatprep.subr.bf16.mxu1 %v485_v0 }
  0x53   :  { %372 = vmatpush3.bf16.msra.mxu1 %v371_v29 }
  0x54   :  { %373 = vmatprep.subr.bf16.mxu1 %v485_v0 }
  0x57   :  { %375 = vmatpush3.bf16.msra.mxu1 %v374_v32 }
 0x114   :  { %v159_v34 = vpop.f32.mrb[0].mxu0 }
 0x115   :  { %v160_v35 = vadd.f32 %v272_v33, %v159_v34  ;;  %v310_v36 = vpop.f32.mrb[1].mxu0 }
 0x117   :  { %vm164_vm2 = vcmp.ge.f32.partialorder %v160_v35, 1.0 }
 0x118   :  { %v168_v37 = vsel %vm164_vm2, 0.0, %v160_v35  ;;  %344 = vmatmul.mubr.msk.f32.vlgmr.msra.gmra.mrb[0].mxu1 %vm164_vm2, %v488_v38 }
 0x119   :  { %253 = vst [vmem:[#allocation10] sm:$0xff] %v168_v37 }
 0x1eb   :  { %v242_v40 = vpop.f32.mrb[0].mxu1 }
 0x1ec   :  { %v243_v41 = vadd.f32 %v275_v39, %v242_v40  ;;  %v345_v42 = vpop.f32.mrb[1].mxu1 }
 0x1ee   :  { %vm249_vm3 = vcmp.ge.f32.partialorder %v243_v41, 1.0 }
 0x1ef   :  { %v276_v43 = vsel %vm249_vm3, 1.0, %v487_v1  ;;  %v252_v44 = vsel %vm249_vm3, 0.0, %v243_v41 }
 0x1f0   :  { %254 = vst [vmem:[#allocation10 + $0x8] sm:$0xff] %v252_v44  ;;  %255 = vst [vmem:[#allocation10 + $0x10] sm:$0xff] %v276_v43 }
 0x1f1   :  { %463 = shalt.err (!%p460_p0)
}
 0x1f2   :  { %s464_s10 = scalar_lea.hbm %s588_s5, 384 }
 0x1f3   :  { %p465_p1 = scmp.ne.s32.totalorder %s588_s5, %s464_s10  ;;  %p468_p2 = scmp.lt.u32.totalorder %s464_s10, %s588_s5 }
 0x1f5   :  { %p470_p3 = pnand %p468_p2, %p465_p1 }
 0x1f7   :  { %473 = shalt.err (!%p470_p3)
}
 0x1f8   :  { %265 = dma.vmem_to_hbm [thread:$0]  %s263_s8, 384, %s588_s5, [#allocation6]  }
 0x1f9   :  { %478 = dma.done.wait [#allocation6], 384  }
 0x1fa   :  { %479 = vsyncadd [#allocation6], 4294966912 }
 0x1fb   :  { %269 = vsyncpa [#allocation5], 1 }
 0x1fc   :  { %270 = vsyncpa [#allocation8], 1 }
 0x1fd   :  { %271 = vsyncpa [#allocation6], 1 }

</bundles_post_ra>
